<compile_context>
chip_gen: v7x
topology: tpu7x:2x2x1
jax: 0.10.0
libtpu: 0.0.40
codegen_flags: <defaults>
</compile_context>

<pallas_src>
import math
import functools

import jax
import jax.numpy as jnp
from jax.experimental import pallas as pl
from jax.experimental.pallas import tpu as pltpu


def _round_up(x, m):
    return ((x + m - 1) // m) * m


# ----------------------------------------------------------------------------
# Kernel set 1: input_proj (1x1 conv == per-pixel matmul) + GroupNorm(32)
#   pass A: accumulate per-group sum / sum-of-squares across HW tiles
#   pass B: recompute y for each HW tile and normalize with the global stats
# ----------------------------------------------------------------------------
def _gn_stats_kernel(x_ref, w_ref, params_ref, onehot_ref, stats_ref,
                     *, hw, thw, needs_mask):
    t = pl.program_id(1)

    @pl.when(t == 0)
    def _():
        stats_ref[...] = jnp.zeros_like(stats_ref)

    pr = params_ref[...]                                            # (3, C) f32
    y = jnp.dot(x_ref[0], w_ref[...],
                preferred_element_type=jnp.float32) + pr[0:1, :]    # (THW, C) f32
    if needs_mask:  # static python branch: zero rows beyond the true HW
        row = t * thw + jax.lax.broadcasted_iota(jnp.int32, (thw, 1), 0)
        y = y * (row < hw).astype(jnp.float32)

    csum = jnp.sum(y, axis=0, keepdims=True)                        # (1, C)
    cssq = jnp.sum(y * y, axis=0, keepdims=True)                    # (1, C)
    # channel sums -> group sums via tiny (C, G) one-hot (no C x C matmul)
    gsum = jnp.dot(csum, onehot_ref[...], preferred_element_type=jnp.float32)
    gssq = jnp.dot(cssq, onehot_ref[...], preferred_element_type=jnp.float32)
    stats_ref[0] = stats_ref[0] + jnp.concatenate([gsum, gssq], axis=0)


def _gn_apply_kernel(x_ref, w_ref, params_ref, spread_ref, stats_ref, o_ref,
                     *, count, eps):
    pr = params_ref[...]                                            # rows: bias, gamma, beta
    y = jnp.dot(x_ref[0], w_ref[...],
                preferred_element_type=jnp.float32) + pr[0:1, :]    # (THW, C) f32
    gsum = stats_ref[0, 0:1, :]                                     # (1, G)
    gssq = stats_ref[0, 1:2, :]                                     # (1, G)
    # broadcast group stats back to channels via tiny (G, C) one-hot
    mean = jnp.dot(gsum, spread_ref[...], preferred_element_type=jnp.float32) / count
    ex2 = jnp.dot(gssq, spread_ref[...], preferred_element_type=jnp.float32) / count
    var = jnp.maximum(ex2 - mean * mean, 0.0)                       # clamp E[y^2]-m^2 >= 0
    y = (y - mean) * jax.lax.rsqrt(var + eps)
    o_ref[0] = (y * pr[1:2, :] + pr[2:3, :]).astype(o_ref.dtype)


def input_proj_groupnorm(x, w, b, gamma, beta, num_groups=32, eps=1e-5):
    """x: (B, HW, Cin) channels-last float32; w: (Cin, Cout). Returns (B, HW, Cout)."""
    B, HW, Cin = x.shape
    Cout = w.shape[1]
    G = num_groups
    cg = Cout // G
    count = float(HW * cg)

    thw = min(512, _round_up(HW, 16))
    n_hw = -(-HW // thw)
    hwp = n_hw * thw
    needs_mask = hwp != HW
    if needs_mask:
        x = jnp.pad(x, ((0, 0), (0, hwp - HW), (0, 0)))

    xb = x.astype(jnp.bfloat16)                       # bf16 MXU operands, f32 accumulate
    wb = w.astype(jnp.bfloat16)
    params = jnp.stack([b, gamma, beta], axis=0).astype(jnp.float32)        # (3, C)
    gid = jnp.arange(Cout) // cg
    onehot = (gid[:, None] == jnp.arange(G)[None, :]).astype(jnp.float32)   # (C, G)
    spread = onehot.T                                                       # (G, C)

    const = lambda shape: pl.BlockSpec(shape, lambda bb, tt: (0,) * len(shape))

    stats = pl.pallas_call(
        functools.partial(_gn_stats_kernel, hw=HW, thw=thw, needs_mask=needs_mask),
        out_shape=jax.ShapeDtypeStruct((B, 2, G), jnp.float32),
        grid=(B, n_hw),
        in_specs=[
            pl.BlockSpec((1, thw, Cin), lambda bb, tt: (bb, tt, 0)),
            const((Cin, Cout)),
            const((3, Cout)),
            const((Cout, G)),
        ],
        out_specs=pl.BlockSpec((1, 2, G), lambda bb, tt: (bb, 0, 0)),
        compiler_params=pltpu.CompilerParams(
            dimension_semantics=("parallel", "arbitrary")),
    )(xb, wb, params, onehot)

    out = pl.pallas_call(
        functools.partial(_gn_apply_kernel, count=count, eps=eps),
        out_shape=jax.ShapeDtypeStruct((B, hwp, Cout), jnp.float32),
        grid=(B, n_hw),
        in_specs=[
            pl.BlockSpec((1, thw, Cin), lambda bb, tt: (bb, tt, 0)),
            const((Cin, Cout)),
            const((3, Cout)),
            const((G, Cout)),
            pl.BlockSpec((1, 2, G), lambda bb, tt: (bb, 0, 0)),
        ],
        out_specs=pl.BlockSpec((1, thw, Cout), lambda bb, tt: (bb, tt, 0)),
        compiler_params=pltpu.CompilerParams(
            dimension_semantics=("parallel", "parallel")),
    )(xb, wb, params, spread, stats)

    return out[:, :HW] if needs_mask else out


# ----------------------------------------------------------------------------
# Kernel 2: detection head (class linear + bbox MLP + inverse_sigmoid + sigmoid)
#   single collapsed M = L*B*Q row axis; fused [class | bbox-layer-1] matmul;
#   128-lane-padded outputs (unmasked stores).
# ----------------------------------------------------------------------------
def _head_kernel(hs_ref, ref_ref, wf_ref, bf_ref, w2_ref, b2_ref, w3_ref, b3_ref,
                 logits_ref, boxes_ref, *, ncp, eps):
    h = hs_ref[...]                                                 # (TM, D) bf16
    # fused class + bbox-layer-1 matmul (shared LHS, one wide MXU dot)
    y = jnp.dot(h, wf_ref[...], preferred_element_type=jnp.float32) + bf_ref[...]
    logits_ref[...] = y[:, :ncp].astype(logits_ref.dtype)           # lane-dense store

    t = jnp.maximum(y[:, ncp:], 0.0)
    t = jnp.dot(t.astype(jnp.bfloat16), w2_ref[...],
                preferred_element_type=jnp.float32) + b2_ref[...]
    t = jnp.maximum(t, 0.0)
    t = jnp.dot(t.astype(jnp.bfloat16), w3_ref[...],
                preferred_element_type=jnp.float32) + b3_ref[...]   # (TM, 128)

    # inverse_sigmoid(reference); padded reference lanes hold 0.5 -> contribute 0
    r = jnp.clip(ref_ref[...], 0.0, 1.0)
    inv = jnp.log(jnp.maximum(r, eps)) - jnp.log(jnp.maximum(1.0 - r, eps))
    boxes_ref[...] = jax.nn.sigmoid(t + inv).astype(boxes_ref.dtype)


def detection_head(hs, references, p):
    """hs: (L, B, Q, D); references: (L, B, Q, 2 or 4). Returns (logits, boxes)."""
    L, B, Q, D = hs.shape
    NC = p["wc"].shape[1]
    rd = references.shape[-1]          # 2 here; 4 with box refinement (handled too)
    M = L * B * Q
    NCP = _round_up(NC, 128)
    BOXP = 128

    tm = min(256, _round_up(M, 16))
    mp = _round_up(M, tm)

    hs_flat = hs.reshape(M, D).astype(jnp.bfloat16)
    if mp != M:
        hs_flat = jnp.pad(hs_flat, ((0, mp - M), (0, 0)))
    # references padded with 0.5 (inverse_sigmoid(0.5) == 0, so padded lanes add 0)
    ref_pad = jnp.full((mp, BOXP), 0.5, jnp.float32)
    ref_pad = ref_pad.at[:M, :rd].set(references.reshape(M, rd))

    wc_pad = jnp.zeros((D, NCP), jnp.float32).at[:, :NC].set(p["wc"])
    bc_pad = jnp.zeros((NCP,), jnp.float32).at[:NC].set(p["bc"])
    wf = jnp.concatenate([wc_pad, p["w1"]], axis=1).astype(jnp.bfloat16)   # (D, NCP+D)
    bf = jnp.concatenate([bc_pad, p["b1"]])[None, :].astype(jnp.float32)   # (1, NCP+D)
    w2 = p["w2"].astype(jnp.bfloat16)
    b2 = p["b2"][None, :].astype(jnp.float32)
    w3p = jnp.zeros((D, BOXP), jnp.float32).at[:, :4].set(p["w3"]).astype(jnp.bfloat16)
    b3p = jnp.zeros((BOXP,), jnp.float32).at[:4].set(p["b3"])[None, :]

    const = lambda shape: pl.BlockSpec(shape, lambda i: (0,) * len(shape))

    logits_p, boxes_p = pl.pallas_call(
        functools.partial(_head_kernel, ncp=NCP, eps=1e-5),
        out_shape=(jax.ShapeDtypeStruct((mp, NCP), jnp.float32),
                   jax.ShapeDtypeStruct((mp, BOXP), jnp.float32)),
        grid=(mp // tm,),
        in_specs=[
            pl.BlockSpec((tm, D), lambda i: (i, 0)),
            pl.BlockSpec((tm, BOXP), lambda i: (i, 0)),
            const((D, NCP + D)), const((1, NCP + D)),
            const((D, D)), const((1, D)),
            const((D, BOXP)), const((1, BOXP)),
        ],
        out_specs=(pl.BlockSpec((tm, NCP), lambda i: (i, 0)),
                   pl.BlockSpec((tm, BOXP), lambda i: (i, 0))),
        compiler_params=pltpu.CompilerParams(dimension_semantics=("parallel",)),
    )(hs_flat, ref_pad, wf, bf, w2, b2, w3p, b3p)

    logits = logits_p[:M, :NC].reshape(L, B, Q, NC)
    boxes = boxes_p[:M, :4].reshape(L, B, Q, 4)
    return logits, boxes


# ----------------------------------------------------------------------------
if __name__ == "__main__":
    key = jax.random.PRNGKey(0)
    ks = jax.random.split(key, 20)

    B, D, Q, L, NC = 2, 32, 8, 2, 8          # batch, hidden_dim, queries, dec layers, classes
    num_groups = 32
    levels = [(4, 16, 16), (8, 8, 8)]        # (C, H, W) per backbone level

    # --- backbone features (synthetic; backbone is an external torch module).
    #     Emitted channels-last so no NCHW transpose sits in the hot path. ---
    feats = [jax.random.normal(ks[i], (B, h, w, c), jnp.float32)
             for i, (c, h, w) in enumerate(levels)]

    # --- input_proj params: 1x1 conv (xavier_uniform, bias=0) + GroupNorm(32, D) ---
    proj_params = []
    for i, (c, h, w) in enumerate(levels):
        bound = math.sqrt(6.0 / (c + D))
        proj_params.append(dict(
            w=jax.random.uniform(ks[4 + i], (c, D), jnp.float32, -bound, bound),
            b=jnp.zeros((D,), jnp.float32),
            gamma=jnp.ones((D,), jnp.float32),
            beta=jnp.zeros((D,), jnp.float32)))

    # --- detection-head params (init matches the module's __init__) ---
    prior_prob = 0.01
    bias_value = -math.log((1 - prior_prob) / prior_prob)
    bnd = 1.0 / math.sqrt(D)
    head = dict(
        wc=jax.random.uniform(ks[8], (D, NC), jnp.float32, -bnd, bnd),
        bc=jnp.full((NC,), bias_value, jnp.float32),
        w1=jax.random.uniform(ks[9], (D, D), jnp.float32, -bnd, bnd),
        b1=jnp.zeros((D,), jnp.float32),
        w2=jax.random.uniform(ks[10], (D, D), jnp.float32, -bnd, bnd),
        b2=jnp.zeros((D,), jnp.float32),
        w3=jnp.zeros((D, 4), jnp.float32),                         # constant_(weight, 0)
        b3=jnp.array([0.0, 0.0, -2.0, -2.0], jnp.float32),         # bias, bias[2:] = -2.0
    )
    # query_embed exists in the module but is consumed by the external transformer.
    query_embed = jax.random.normal(ks[11], (Q, 2 * D), jnp.float32)  # noqa: F841

    # --- transformer outputs (synthetic; transformer is an external torch module) ---
    hs = jax.random.normal(ks[12], (L, B, Q, D), jnp.float32)
    init_reference = jax.random.uniform(ks[13], (B, Q, 2), jnp.float32, 0.05, 0.95)
    inter_references = jax.random.uniform(ks[14], (L, B, Q, 2), jnp.float32, 0.05, 0.95)
    references = jnp.concatenate([init_reference[None], inter_references[:L - 1]], axis=0)

    # ---------------------------- forward ----------------------------
    srcs = []
    for feat, p in zip(feats, proj_params):
        Bc, H, W, C = feat.shape
        x = feat.reshape(Bc, H * W, C)                              # channels-last, flat HW
        srcs.append(input_proj_groupnorm(x, p["w"], p["b"], p["gamma"], p["beta"],
                                         num_groups=num_groups))
    # TODO(synk): extra pyramid levels (num_feature_levels > len(backbone outs)) use a
    # 3x3 stride-2 conv; not exercised here since num_feature_levels == len(levels).

    outputs_class, outputs_coord = detection_head(hs, references, head)

    out = {"pred_logits": outputs_class[-1], "pred_boxes": outputs_coord[-1]}
    out["aux_outputs"] = [{"pred_logits": a, "pred_boxes": b}
                          for a, b in zip(outputs_class[:-1], outputs_coord[:-1])]
    # TODO(synk): training-only UDA / MAE / prototype-alignment branches (grad-reverse
    # discriminators, get_prototype_class_wise, D_img) are not part of the eval forward.

    jax.block_until_ready((srcs, outputs_class, outputs_coord))

    # ------------------ correctness check vs plain-JAX f32 reference ------------------
    def ref_proj(x, w, b, gamma, beta, groups=32, eps=1e-5):
        y = x @ w + b
        Bn, HW, C = y.shape
        yg = y.reshape(Bn, HW, groups, C // groups)
        mean = yg.mean(axis=(1, 3), keepdims=True)
        var = yg.var(axis=(1, 3), keepdims=True)
        return ((yg - mean) / jnp.sqrt(var + eps)).reshape(Bn, HW, C) * gamma + beta

    def inv_sig(x, eps=1e-5):
        x = jnp.clip(x, 0.0, 1.0)
        return jnp.log(jnp.maximum(x, eps) / jnp.maximum(1.0 - x, eps))

    tol = dict(atol=3e-2, rtol=3e-2)        # kernels use bf16 MXU operands
    ok = True
    for feat, p, src in zip(feats, proj_params, srcs):
        Bc, H, W, C = feat.shape
        x = feat.reshape(Bc, H * W, C)
        ref = ref_proj(x, p["w"], p["b"], p["gamma"], p["beta"], groups=num_groups)
        ok = ok and bool(jnp.allclose(src, ref, **tol))

    ref_logits = hs @ head["wc"] + head["bc"]
    t = jax.nn.relu(hs @ head["w1"] + head["b1"])
    t = jax.nn.relu(t @ head["w2"] + head["b2"])
    t = t @ head["w3"] + head["b3"]
    t = t.at[..., :2].add(inv_sig(references))
    ref_boxes = jax.nn.sigmoid(t)
    ok = ok and bool(jnp.allclose(outputs_class, ref_logits, **tol))
    ok = ok and bool(jnp.allclose(outputs_coord, ref_boxes, **tol))
    assert ok, "mismatch vs reference"

    print("KERNEL_OK")
</pallas_src>

<mosaic_0001>
module attributes {stable_mosaic.version = 11 : i64} {
  func.func @_gn_stats_kernel(%arg0: i32, %arg1: i32, %arg2: memref<1x256x4xbf16, #tpu.memory_space<vmem>>, %arg3: memref<4x32xbf16, #tpu.memory_space<vmem>>, %arg4: memref<3x32xf32, #tpu.memory_space<vmem>>, %arg5: memref<32x32xf32, #tpu.memory_space<vmem>>, %arg6: memref<1x2x32xf32, #tpu.memory_space<vmem>>) attributes {dimension_semantics = [#tpu.dimension_semantics<parallel>, #tpu.dimension_semantics<arbitrary>], iteration_bounds = array<i64: 2, 1>, scalar_prefetch = 0 : i64, scratch_operands = 0 : i64, tpu.core_type = #tpu.core_type<tc>, window_params = [{transform_indices = @transform_0, window_bounds = array<i64: 1, 256, 4>}, {pipeline_mode = #tpu.pipeline_mode<synchronous>, transform_indices = @transform_1, window_bounds = array<i64: 4, 32>}, {pipeline_mode = #tpu.pipeline_mode<synchronous>, transform_indices = @transform_2, window_bounds = array<i64: 3, 32>}, {pipeline_mode = #tpu.pipeline_mode<synchronous>, transform_indices = @transform_3, window_bounds = array<i64: 32, 32>}, {transform_indices = @transform_4, window_bounds = array<i64: 1, 2, 32>}]} {
    %c0_i32 = arith.constant 0 : i32
    %0 = arith.cmpi eq, %arg1, %c0_i32 : i32
    %1 = arith.extui %0 : i1 to i32
    %c0_i32_0 = arith.constant 0 : i32
    %2 = arith.cmpi ne, %1, %c0_i32_0 : i32
    scf.if %2 {
      %cst_21 = arith.constant 0.000000e+00 : f32
      %27 = vector.broadcast %cst_21 : f32 to vector<1x2x32xf32>
      %c0_22 = arith.constant 0 : index
      %c0_23 = arith.constant 0 : index
      %c0_24 = arith.constant 0 : index
      %28 = vector.load %arg6[%c0_22, %c0_23, %c0_24] : memref<1x2x32xf32, #tpu.memory_space<vmem>>, vector<1x2x32xf32>
      tpu.vector_store %arg6[%c0_22, %c0_23, %c0_24], %27 {strides = array<i32>} : memref<1x2x32xf32, #tpu.memory_space<vmem>>, vector<1x2x32xf32>,
    } else {
    }
    %c0 = arith.constant 0 : index
    %c0_1 = arith.constant 0 : index
    %3 = vector.load %arg4[%c0, %c0_1] : memref<3x32xf32, #tpu.memory_space<vmem>>, vector<3x32xf32>
    %c0_2 = arith.constant 0 : index
    %c0_3 = arith.constant 0 : index
    %c0_4 = arith.constant 0 : index
    %4 = vector.load %arg2[%c0_2, %c0_3, %c0_4] : memref<1x256x4xbf16, #tpu.memory_space<vmem>>, vector<1x256x4xbf16>
    %5 = vector.shape_cast %4 : vector<1x256x4xbf16> to vector<256x4xbf16>
    %c0_5 = arith.constant 0 : index
    %c0_6 = arith.constant 0 : index
    %6 = vector.load %arg3[%c0_5, %c0_6] : memref<4x32xbf16, #tpu.memory_space<vmem>>, vector<4x32xbf16>
    %cst = arith.constant dense<0.000000e+00> : vector<256x32xf32>
    %7 = tpu.matmul %5, %6, %cst {dimension_numbers = #tpu.dot_dimension_numbers<[1], [0], [0], [1], [0, 0, 1, 1], [], []>} : vector<256x4xbf16>, vector<4x32xbf16>, vector<256x32xf32> -> vector<256x32xf32>
    %8 = vector.extract_strided_slice %3 {offsets = [0, 0], sizes = [1, 32], strides = [1, 1]} : vector<3x32xf32> to vector<1x32xf32>
    %9 = vector.broadcast %8 : vector<1x32xf32> to vector<256x32xf32>
    %10 = arith.addf %7, %9 : vector<256x32xf32>
    %cst_7 = arith.constant dense<0.000000e+00> : vector<32xf32>
    %11 = vector.multi_reduction <add>, %10, %cst_7 [0] : vector<256x32xf32> to vector<32xf32>
    %12 = vector.shape_cast %11 : vector<32xf32> to vector<1x32xf32>
    %13 = arith.mulf %10, %10 : vector<256x32xf32>
    %cst_8 = arith.constant dense<0.000000e+00> : vector<32xf32>
    %14 = vector.multi_reduction <add>, %13, %cst_8 [0] : vector<256x32xf32> to vector<32xf32>
    %15 = vector.shape_cast %14 : vector<32xf32> to vector<1x32xf32>
    %c0_9 = arith.constant 0 : index
    %c0_10 = arith.constant 0 : index
    %16 = vector.load %arg5[%c0_9, %c0_10] : memref<32x32xf32, #tpu.memory_space<vmem>>, vector<32x32xf32>
    %cst_11 = arith.constant dense<0.000000e+00> : vector<1x32xf32>
    %17 = tpu.matmul %12, %16, %cst_11 {dimension_numbers = #tpu.dot_dimension_numbers<[1], [0], [0], [1], [0, 0, 1, 1], [], []>} : vector<1x32xf32>, vector<32x32xf32>, vector<1x32xf32> -> vector<1x32xf32>
    %c0_12 = arith.constant 0 : index
    %c0_13 = arith.constant 0 : index
    %18 = vector.load %arg5[%c0_12, %c0_13] : memref<32x32xf32, #tpu.memory_space<vmem>>, vector<32x32xf32>
    %cst_14 = arith.constant dense<0.000000e+00> : vector<1x32xf32>
    %19 = tpu.matmul %15, %18, %cst_14 {dimension_numbers = #tpu.dot_dimension_numbers<[1], [0], [0], [1], [0, 0, 1, 1], [], []>} : vector<1x32xf32>, vector<32x32xf32>, vector<1x32xf32> -> vector<1x32xf32>
    %c0_15 = arith.constant 0 : index
    %c0_16 = arith.constant 0 : index
    %c0_17 = arith.constant 0 : index
    %20 = vector.load %arg6[%c0_15, %c0_16, %c0_17] : memref<1x2x32xf32, #tpu.memory_space<vmem>>, vector<1x2x32xf32>
    %21 = vector.shape_cast %20 : vector<1x2x32xf32> to vector<2x32xf32>
    %22 = tpu.concatenate %17, %19 in 0 : vector<1x32xf32>, vector<1x32xf32> -> vector<2x32xf32>
    %23 = arith.addf %21, %22 : vector<2x32xf32>
    %c0_18 = arith.constant 0 : index
    %c0_19 = arith.constant 0 : index
    %c0_20 = arith.constant 0 : index
    %24 = vector.load %arg6[%c0_18, %c0_19, %c0_20] : memref<1x2x32xf32, #tpu.memory_space<vmem>>, vector<1x2x32xf32>
    %25 = vector.shape_cast %24 : vector<1x2x32xf32> to vector<2x32xf32>
    %26 = vector.shape_cast %23 : vector<2x32xf32> to vector<1x2x32xf32>
    tpu.vector_store %arg6[%c0_18, %c0_19, %c0_20], %26 {strides = array<i32>} : memref<1x2x32xf32, #tpu.memory_space<vmem>>, vector<1x2x32xf32>,
    return
  }
  func.func @transform_0(%arg0: i32, %arg1: i32) -> (i32, i32, i32) {
    %c0_i32 = arith.constant 0 : i32
    %c0_i32_0 = arith.constant 0 : i32
    return %arg0, %arg1, %c0_i32 : i32, i32, i32
  }
  func.func @transform_1(%arg0: i32, %arg1: i32) -> (i32, i32) {
    %c0_i32 = arith.constant 0 : i32
    %c0_i32_0 = arith.constant 0 : i32
    %c0_i32_1 = arith.constant 0 : i32
    return %c0_i32, %c0_i32_0 : i32, i32
  }
  func.func @transform_2(%arg0: i32, %arg1: i32) -> (i32, i32) {
    %c0_i32 = arith.constant 0 : i32
    %c0_i32_0 = arith.constant 0 : i32
    %c0_i32_1 = arith.constant 0 : i32
    return %c0_i32, %c0_i32_0 : i32, i32
  }
  func.func @transform_3(%arg0: i32, %arg1: i32) -> (i32, i32) {
    %c0_i32 = arith.constant 0 : i32
    %c0_i32_0 = arith.constant 0 : i32
    %c0_i32_1 = arith.constant 0 : i32
    return %c0_i32, %c0_i32_0 : i32, i32
  }
  func.func @transform_4(%arg0: i32, %arg1: i32) -> (i32, i32, i32) {
    %c0_i32 = arith.constant 0 : i32
    %c0_i32_0 = arith.constant 0 : i32
    %c0_i32_1 = arith.constant 0 : i32
    return %arg0, %c0_i32, %c0_i32_0 : i32, i32, i32
  }
}

</mosaic_0001>

<bundles_post_ra>
// kernel: tpu_custom_call.1
= control target key start
LH: loop header
LB: loop body
LE: loop exit
PB: predicated region body
PF: predicated region fallthrough
CT: control target
= control target key end

     0   :  { %9 = vsyncpa [#allocation3], 0  ;;  %s1628_s0 = inlined_call_operand.vmem [shape: bf16[2,256,4], index: 0, kind: input, shape index: {}]   ;;  %s1629_s1 = inlined_call_operand.vmem [shape: bf16[4,32], index: 1, kind: input, shape index: {}]   ;;  %s1630_s2 = inlined_call_operand.vmem [shape: f32[3,32], index: 2, kind: input, shape index: {}]   ;;  %s1631_s3 = inlined_call_operand.vmem [shape: f32[32,32], index: 3, kind: input, shape index: {}]   ;;  %s1632_s4 = inlined_call_operand.hbm [shape: f32[2,2,32], index: 4, kind: output, shape index: {}]  }
   0x1   :  { %11 = vsyncpa [#allocation3 + $0x1], 0  ;;  %s1309_s15 = smov 0   ;;  %s1311_s16 = smov 0  }
   0x2   :  { %s1313_s17 = smov 0   ;;  %s1315_s18 = smov 0  }
   0x3   :  { %s1317_s19 = smov 0   ;;  %s1319_s20 = smov 0  }
   0x4 LB: > { %s980_s21 = sadd.s32 4294967295, %s1278_s20   ;;  %s981_s22 = sadd.s32 4294967294, %s1278_s20   ;;  %s1278_s20 = sphi %s1319_s20, %s17_s20   ;;  %s1274_s19 = sphi %s1317_s19, %s1639_s19   ;;  %s1270_s18 = sphi %s1315_s18, %s1638_s18   ;;  %s1266_s17 = sphi %s1313_s17, %s1637_s17   ;;  %s1262_s16 = sphi %s1311_s16, %s1636_s16   ;;  %s1258_s15 = sphi %s1309_s15, %s1635_s15  }
   0x5   : > { %s29_s23 = sadd.s32 1, %s1274_s19  ;;  %s127_s24 = sadd.s32 1, %s1266_s17 }
   0x6   : > { %p31_p0 = scmp.ge.s32.totalorder %s29_s23, 2  ;;  %p137_p1 = scmp.ne.s32.totalorder %s1266_s17, %s1262_s16 }
   0x7   : > { %p138_p2 = scmp.eq.s32.totalorder %s980_s21, 1  ;;  %p143_p3 = scmp.ne.s32.totalorder %s1262_s16, %s1258_s15 }
   0x8   : > { %s1641_s23 = smov (%p31_p0, %s29_s23), 0  ;;  %p144_p5 = scmp.eq.s32.totalorder %s981_s22, 1 }
   0x9   : > { %p1349_p4 = por %p138_p2, %p137_p1  ;;  %s124_s26 = ssub.s32 %s1274_s19, %s1641_s23 }
   0xa   : > { %p984_p6 = scmp.ge.s32.totalorder %s1278_s20, 1  ;;  %p125_p7 = scmp.eq.s32.totalorder %s124_s26, 0 }
   0xb   : > { %p1356_p8 = por %p144_p5, %p143_p3  ;;  %p184_p9 = scmp.lt.s32.totalorder %s1278_s20, 3 }
   0xc   : > { %s1362_s28 = scalar_select %p125_p7, %s1266_s17, %s127_s24  }
   0xd   : > { %p185_p10 = pnand %p984_p6, %p184_p9 }
   0xe   : > { %v264_v0 = vld [vmem:[%s1629_s1] sm:$0x3] (!%p185_p10)  ;;  %vm398_vm0 = vcmask (!%p185_p10), 1041408   ;;  %p215_p11 = scmp.lt.s32.totalorder (!%p185_p10), %s1270_s18, 1  ;;  %vm349_vm1 = vcmask (!%p185_p10), 31744   ;;  %v735_v19 = vld [vmem:[%s1631_s3 + $0x8] sm:$0xff] (!%p185_p10)  ;;  %v265_v26 = vlaneseq (!%p185_p10) }
   0xf   : > { %188 = sbr.rel (%p185_p10) target bundleno = 559 (0x22f), region = 36  ;;  %1124 = vmatprep.subr.msk.bf16.mxu0 (!%p185_p10), %vm398_vm0, %v264_v0  ;;  %v400_v1 = vsel (!%p185_p10), %vm398_vm0, %v264_v0, 0  ;;  %1125 = vmatprep.subr.msk.bf16.mxu1 (!%p185_p10), %vm398_vm0, %v264_v0  ;;  %v734_v18 = vld [vmem:[%s1631_s3] sm:$0xff] (!%p185_p10)  ;;  %v1280_v21 = vmov (!%p185_p10), 0.0|0.0   ;;  %v736_v22 = vld [vmem:[%s1631_s3 + $0x10] sm:$0xff] (!%p185_p10)  ;;  %v737_v23 = vld [vmem:[%s1631_s3 + $0x18] sm:$0xff] (!%p185_p10) }
  0x10   : > { %1055 = vmatpush3.bf16.msra.mxu0 (!%p185_p10), %v400_v1  ;;  %1123 = vmatpush3.bf16.msra.mxu1 (!%p185_p10), %v400_v1  ;;  %v1412_v20 = vpack.c.bf16 (!%p185_p10), %v735_v19, %v734_v18  ;;  %v1423_v24 = vpack.c.bf16 (!%p185_p10), %v737_v23, %v736_v22  ;;  %vm1281_vm2 = vmmov (!%p185_p10), 0   ;;  %v1282_v25 = vmov (!%p185_p10), 0.0   ;;  %v231_v29 = vld [vmem:[%s1630_s2] sm:$0x7] (!%p185_p10)  ;;  %s211_s30 = sand.u32 (!%p185_p10), 1, %s1262_s16   ;;  %s1023_s7 = sshll.u32 (!%p185_p10), %s1270_s18, 5 }
  0x11   : > { %1110 = vmatprep.subr.bf16.mxu1 (!%p185_p10), %v1280_v21  ;;  %v266_v27 = vshrl.u32 (!%p185_p10), %v265_v26, 7  ;;  %vm563_vm3 = vcmask (!%p185_p10), 261120   ;;  %vm229_vm4 = vcmask (!%p185_p10), 254976   ;;  %vm888_vm5 = vcmask (!%p185_p10), 1040384   ;;  %s1580_s11 = scalar_lea.hbm (!%p185_p10), %s1632_s4, %s1023_s7  ;;  %s894_s12 = scalar_lea.sflag (!%p185_p10), [#allocation3], %s211_s30 }
  0x13   : > { %v267_v28 = vsub.s32 (!%p185_p10), 0, %v266_v27 }
  0x15   : > { %v1432_v30 = vrot.slane (!%p185_p10), %v231_v29, %v267_v28 }
  0x16   : > { %s216_s5 = scalar_select %p215_p11, %s1270_s18, 1 }
  0x17   : > { %s1283_s18 = smov [#allocation2]  }
  0x18   : > { %s1026_s6 = sshll.u32 %s216_s5, 7  ;;  %s985_s5 = sshll.u32 %s211_s30, 1 }
  0x19   : > { %s1372_s9 = scalar_lea.vmem %s1628_s0, %s1026_s6  ;;  %s213_s6 = scalar_lea.vmem [#allocation2], %s985_s5 }
  0x1a   : > { %v1184_v2 = vld [vmem:[%s1372_s9] sm:$0xff]   ;;  %v1185_v3 = vld [vmem:[%s1372_s9 + $0x8] sm:$0xff]   ;;  %v1186_v4 = vld [vmem:[%s1372_s9 + $0x10] sm:$0xff]   ;;  %230 = vst.msk [vmem:[%s213_s6] sm:$0x3] %vm229_vm4, %v1282_v25  ;;  %s907_s8 = sshll.u32 %s213_s6, 4  ;;  %s1582_s8 = int_to_ptr.vmem [resolvable:$true] %s907_s8 }
  0x1b   : > { %1056 = vmatprep.mubr.msk.bf16.mxu0 %vm349_vm1, %v1184_v2  ;;  %v1187_v5 = vld [vmem:[%s1372_s9 + $0x18] sm:$0xff]   ;;  %v1188_v6 = vld [vmem:[%s1372_s9 + $0x20] sm:$0xff]   ;;  %v1194_v7 = vld [vmem:[%s1372_s9 + $0x50] sm:$0xff]   ;;  %s1200_s13 = scalar_lea.vmem %s1582_s8, 32  ;;  %s1204_s14 = sshll.u32 %s1283_s18, 4  ;;  %s1205_s14 = int_to_ptr.vmem [resolvable:$false] %s1204_s14 }
  0x1c   : > { %1057 = vmatmul.mubr.msk.bf16.vlgmr.msra.gmra.mrb[0].mxu0 %vm349_vm1, %v1185_v3  ;;  %v1195_v8 = vld [vmem:[%s1372_s9 + $0x58] sm:$0xff]   ;;  %1076 = vmatprep.mubr.msk.bf16.mxu1 %vm349_vm1, %v1194_v7  ;;  %v1196_v9 = vld [vmem:[%s1372_s9 + $0x60] sm:$0xff]   ;;  %v1189_v10 = vld [vmem:[%s1372_s9 + $0x28] sm:$0xff]   ;;  %p1201_p12 = scmp.ne.s32.totalorder %s1582_s8, %s1200_s13  ;;  %s1206_s21 = scalar_lea.vmem %s1205_s14, 64 }
  0x1d   : > { %1060 = vmatprep.mubr.msk.bf16.mxu0 %vm349_vm1, %v1186_v4  ;;  %1077 = vmatmul.mubr.msk.bf16.vlgmr.msra.gmra.mrb[0].mxu1 %vm349_vm1, %v1195_v8  ;;  %v1190_v11 = vld [vmem:[%s1372_s9 + $0x30] sm:$0xff]   ;;  %v1197_v12 = vld [vmem:[%s1372_s9 + $0x68] sm:$0xff]   ;;  %v1191_v14 = vld [vmem:[%s1372_s9 + $0x38] sm:$0xff]   ;;  %p1207_p1 = scmp.lt.s32.totalorder %s1582_s8, %s1205_s14  ;;  %p1208_p2 = scmp.lt.s32.totalorder %s1206_s21, %s1200_s13 }
  0x1e   : > { %1080 = vmatprep.mubr.msk.bf16.mxu1 %vm349_vm1, %v1196_v9  ;;  %v1198_v13 = vld [vmem:[%s1372_s9 + $0x70] sm:$0xff]   ;;  %v1192_v15 = vld [vmem:[%s1372_s9 + $0x40] sm:$0xff]   ;;  %v1199_v16 = vld [vmem:[%s1372_s9 + $0x78] sm:$0xff]   ;;  %1112 = vmatpush3.bf16.msra.mxu1 %v1412_v20  ;;  %p1202_p13 = pnand %p1201_p12, %p1349_p4 }
  0x1f   : > { %v1193_v17 = vld [vmem:[%s1372_s9 + $0x48] sm:$0xff]   ;;  %1113 = vmatprep.subr.bf16.mxu1 %v1280_v21  ;;  %p1209_p3 = por %p1208_p2, %p1207_p1 }
  0x20   : > { %p1203_p0 = pneg %p1202_p13 }
  0x22   : > { %1115 = vmatpush3.bf16.msra.mxu1 %v1423_v24  ;;  %p1210_p5 = pnand %p1209_p3, %p1203_p0 }
  0x23   : > { %1116 = vmatprep.subr.bf16.mxu1 %v1280_v21 }
  0x24   : > { %1061 = vmatmul.mubr.msk.bf16.gmra.mrb[4].mxu0 %vm349_vm1, %v1187_v5 }
  0x25   : > { %1064 = vmatprep.mubr.msk.bf16.mxu0 %vm349_vm1, %v1188_v6  ;;  %1081 = vmatmul.mubr.msk.bf16.gmra.mrb[4].mxu1 %vm349_vm1, %v1197_v12 }
  0x26   : > { %1084 = vmatprep.mubr.msk.bf16.mxu1 %vm349_vm1, %v1198_v13 }
  0x2c   : > { %1065 = vmatmul.mubr.msk.bf16.gmra.mrb[8].mxu0 %vm349_vm1, %v1189_v10 }
  0x2d   : > { %1068 = vmatprep.mubr.msk.bf16.mxu0 %vm349_vm1, %v1190_v11  ;;  %1085 = vmatmul.mubr.msk.bf16.gmra.mrb[8].mxu1 %vm349_vm1, %v1199_v16 }
  0x2e   : > { %1096 = vmatprep.mubr.msk.f32.mxu1 %vm1281_vm2, %v1282_v25 }
  0x34   : > { %1069 = vmatmul.mubr.msk.bf16.gmra.mrb[12].mxu0 %vm349_vm1, %v1191_v14 }
  0x35   : > { %1072 = vmatprep.mubr.msk.bf16.mxu0 %vm349_vm1, %v1192_v15 }
  0x3c   : > { %1073 = vmatmul.mubr.msk.bf16.gmra.mrb[16].mxu0 %vm349_vm1, %v1193_v17 }
  0xef   : > { %v1058_v31 = vpop.f32.mrb[0].mxu0 }
  0xf0   : > { %v436_v32 = vpop.f32.mrb[1].mxu0  ;;  %v445_v33 = vadd.f32 %v1058_v31, %v1432_v30  ;;  %v1446_v57 = vpop.f32.mrb[0].mxu1 }
  0xf1   : > { %v437_v34 = vadd.f32 %v436_v32, %v1432_v30  ;;  %v1059_v35 = vpop.f32.mrb[2].mxu0  ;;  %v1449_v62 = vpop.f32.mrb[1].mxu1 }
  0xf2   : > { %v439_v36 = vpop.f32.mrb[3].mxu0  ;;  %v448_v38 = vadd.f32 %v1059_v35, %v1432_v30  ;;  %v635_v40 = vmul.f32 %v445_v33, %v445_v33  ;;  %v567_v45 = vsel %vm563_vm3, %v445_v33, 0.0  ;;  %v1454_v3 = vpop.f32.mrb[2].mxu1 }
  0xf3   : > { %v633_v37 = vmul.f32 %v437_v34, %v437_v34  ;;  %v440_v39 = vadd.f32 %v439_v36, %v1432_v30  ;;  %v564_v41 = vsel %vm563_vm3, %v437_v34, 0.0  ;;  %v1457_v7 = vpop.f32.mrb[3].mxu1 }
  0xf4   : > { %v636_v47 = vmul.f32 %v448_v38, %v448_v38  ;;  %v668_v53 = vsel %vm563_vm3, %v635_v40, 0.0  ;;  %v569_v54 = vsel %vm563_vm3, %v448_v38, 0.0 }
  0xf5   : > { %v565_v42 = vsel %vm563_vm3, %v440_v39, 0.0  ;;  %v634_v43 = vmul.f32 %v440_v39, %v440_v39  ;;  %v665_v46 = vsel %vm563_vm3, %v633_v37, 0.0 }
  0xf6   : > { %v566_v44 = vadd.f32 %v565_v42, %v564_v41  ;;  %v670_v63 = vsel %vm563_vm3, %v636_v47, 0.0 }
  0xf7   : > { %v666_v48 = vsel %vm563_vm3, %v634_v43, 0.0  ;;  %v1062_v49 = vpop.f32.mrb[4].mxu0 }
  0xf8   : > { %v568_v50 = vadd.f32 %v567_v45, %v566_v44  ;;  %v667_v51 = vadd.f32 %v666_v48, %v665_v46  ;;  %v452_v52 = vpop.f32.mrb[5].mxu0  ;;  %v461_v59 = vadd.f32 %v1062_v49, %v1432_v30  ;;  %v1465_v28 = vpop.f32.mrb[4].mxu1 }
  0xf9   : > { %v453_v55 = vadd.f32 %v452_v52, %v1432_v30  ;;  %v1063_v56 = vpop.f32.mrb[6].mxu0  ;;  %v1469_v34 = vpop.f32.mrb[5].mxu1 }
  0xfa   : > { %v669_v58 = vadd.f32 %v668_v53, %v667_v51  ;;  %v570_v60 = vadd.f32 %v569_v54, %v568_v50  ;;  %v455_v61 = vpop.f32.mrb[7].mxu0  ;;  %v464_v6 = vadd.f32 %v1063_v56, %v1432_v30  ;;  %v639_v10 = vmul.f32 %v461_v59, %v461_v59  ;;  %v1473_v39 = vpop.f32.mrb[6].mxu1 }
  0xfb   : > { %v571_v0 = vsel %vm563_vm3, %v453_v55, 0.0  ;;  %v637_v1 = vmul.f32 %v453_v55, %v453_v55  ;;  %v456_v2 = vadd.f32 %v455_v61, %v1432_v30  ;;  %v575_v14 = vsel %vm563_vm3, %v461_v59, 0.0  ;;  %v1477_v43 = vpop.f32.mrb[7].mxu1 }
  0xfc   : > { %v572_v4 = vadd.f32 %v571_v0, %v570_v60  ;;  %v671_v5 = vadd.f32 %v670_v63, %v669_v58  ;;  %v640_v16 = vmul.f32 %v464_v6, %v464_v6  ;;  %v577_v22 = vsel %vm563_vm3, %v464_v6, 0.0 }
  0xfd   : > { %v672_v8 = vsel %vm563_vm3, %v637_v1, 0.0  ;;  %v573_v9 = vsel %vm563_vm3, %v456_v2, 0.0  ;;  %v638_v13 = vmul.f32 %v456_v2, %v456_v2  ;;  %v676_v29 = vsel %vm563_vm3, %v639_v10, 0.0 }
  0xfe   : > { %v673_v11 = vadd.f32 %v672_v8, %v671_v5  ;;  %v574_v12 = vadd.f32 %v573_v9, %v572_v4  ;;  %v678_v40 = vsel %vm563_vm3, %v640_v16, 0.0 }
  0xff   : > { %v1066_v15 = vpop.f32.mrb[8].mxu0  ;;  %v674_v18 = vsel %vm563_vm3, %v638_v13, 0.0 }
 0x100   : > { %v576_v17 = vadd.f32 %v575_v14, %v574_v12  ;;  %v468_v19 = vpop.f32.mrb[9].mxu0  ;;  %v675_v23 = vadd.f32 %v674_v18, %v673_v11  ;;  %v477_v31 = vadd.f32 %v1066_v15, %v1432_v30  ;;  %v1485_v63 = vpop.f32.mrb[8].mxu1 }
 0x101   : > { %v469_v26 = vadd.f32 %v468_v19, %v1432_v30  ;;  %v1067_v27 = vpop.f32.mrb[10].mxu0  ;;  %v1489_v5 = vpop.f32.mrb[9].mxu1 }
 0x102   : > { %v578_v32 = vadd.f32 %v577_v22, %v576_v17  ;;  %v471_v33 = vpop.f32.mrb[11].mxu0  ;;  %v677_v35 = vadd.f32 %v676_v29, %v675_v23  ;;  %v480_v42 = vadd.f32 %v1067_v27, %v1432_v30  ;;  %v643_v48 = vmul.f32 %v477_v31, %v477_v31  ;;  %v1493_v11 = vpop.f32.mrb[10].mxu1 }
 0x103   : > { %v579_v36 = vsel %vm563_vm3, %v469_v26, 0.0  ;;  %v641_v37 = vmul.f32 %v469_v26, %v469_v26  ;;  %v472_v38 = vadd.f32 %v471_v33, %v1432_v30  ;;  %v583_v50 = vsel %vm563_vm3, %v477_v31, 0.0  ;;  %v1497_v15 = vpop.f32.mrb[11].mxu1 }
 0x104   : > { %v580_v41 = vadd.f32 %v579_v36, %v578_v32  ;;  %v679_v44 = vadd.f32 %v678_v40, %v677_v35  ;;  %v644_v54 = vmul.f32 %v480_v42, %v480_v42  ;;  %v585_v58 = vsel %vm563_vm3, %v480_v42, 0.0 }
 0x105   : > { %v680_v45 = vsel %vm563_vm3, %v641_v37, 0.0  ;;  %v581_v46 = vsel %vm563_vm3, %v472_v38, 0.0  ;;  %v642_v47 = vmul.f32 %v472_v38, %v472_v38  ;;  %v684_v0 = vsel %vm563_vm3, %v643_v48, 0.0 }
 0x106   : > { %v582_v49 = vadd.f32 %v581_v46, %v580_v41  ;;  %v681_v51 = vadd.f32 %v680_v45, %v679_v44  ;;  %v686_v12 = vsel %vm563_vm3, %v644_v54, 0.0  ;;  %v517_v46 = vadd.f32 %v1449_v62, %v1432_v30 }
 0x107   : > { %v682_v52 = vsel %vm563_vm3, %v642_v47, 0.0  ;;  %v1070_v53 = vpop.f32.mrb[12].mxu0 }
 0x108   : > { %v584_v55 = vadd.f32 %v583_v50, %v582_v49  ;;  %v484_v56 = vpop.f32.mrb[13].mxu0  ;;  %v683_v59 = vadd.f32 %v682_v52, %v681_v51  ;;  %v493_v1 = vadd.f32 %v1070_v53, %v1432_v30 }
 0x109   : > { %v485_v60 = vadd.f32 %v484_v56, %v1432_v30  ;;  %v1071_v61 = vpop.f32.mrb[14].mxu0 }
 0x10a   : > { %v586_v2 = vadd.f32 %v585_v58, %v584_v55  ;;  %v487_v4 = vpop.f32.mrb[15].mxu0  ;;  %v685_v6 = vadd.f32 %v684_v0, %v683_v59  ;;  %v496_v14 = vadd.f32 %v1071_v61, %v1432_v30  ;;  %v647_v22 = vmul.f32 %v493_v1, %v493_v1 }
 0x10b   : > { %v587_v8 = vsel %vm563_vm3, %v485_v60, 0.0  ;;  %v645_v9 = vmul.f32 %v485_v60, %v485_v60  ;;  %v488_v10 = vadd.f32 %v487_v4, %v1432_v30  ;;  %v591_v26 = vsel %vm563_vm3, %v493_v1, 0.0 }
 0x10c   : > { %v588_v13 = vadd.f32 %v587_v8, %v586_v2  ;;  %v687_v16 = vadd.f32 %v686_v12, %v685_v6  ;;  %v648_v32 = vmul.f32 %v496_v14, %v496_v14  ;;  %v593_v36 = vsel %vm563_vm3, %v496_v14, 0.0 }
 0x10d   : > { %v688_v17 = vsel %vm563_vm3, %v645_v9, 0.0  ;;  %v589_v18 = vsel %vm563_vm3, %v488_v10, 0.0  ;;  %v646_v19 = vmul.f32 %v488_v10, %v488_v10  ;;  %v692_v41 = vsel %vm563_vm3, %v647_v22, 0.0 }
 0x10e   : > { %v590_v23 = vadd.f32 %v589_v18, %v588_v13  ;;  %v689_v27 = vadd.f32 %v688_v17, %v687_v16  ;;  %v694_v51 = vsel %vm563_vm3, %v648_v32, 0.0  ;;  %v653_v1 = vmul.f32 %v517_v46, %v517_v46 }
 0x10f   : > { %v690_v29 = vsel %vm563_vm3, %v646_v19, 0.0  ;;  %v1074_v31 = vpop.f32.mrb[16].mxu0  ;;  %v520_v6 = vadd.f32 %v1457_v7, %v1432_v30  ;;  %v603_v10 = vsel %vm563_vm3, %v517_v46, 0.0  ;;  %v525_v13 = vadd.f32 %v1446_v57, %v1432_v30 }
 0x110   : > { %v592_v33 = vadd.f32 %v591_v26, %v590_v23  ;;  %v500_v35 = vpop.f32.mrb[17].mxu0  ;;  %v691_v37 = vadd.f32 %v690_v29, %v689_v27  ;;  %v509_v42 = vadd.f32 %v1074_v31, %v1432_v30  ;;  %v704_v17 = vsel %vm563_vm3, %v653_v1, 0.0 }
 0x111   : > { %v501_v38 = vadd.f32 %v500_v35, %v1432_v30  ;;  %v1075_v40 = vpop.f32.mrb[18].mxu0  ;;  %v528_v18 = vadd.f32 %v1454_v3, %v1432_v30  ;;  %v654_v22 = vmul.f32 %v520_v6, %v520_v6  ;;  %v533_v23 = vadd.f32 %v1469_v34, %v1432_v30 }
 0x112   : > { %v594_v44 = vadd.f32 %v593_v36, %v592_v33  ;;  %v503_v45 = vpop.f32.mrb[19].mxu0  ;;  %v693_v47 = vadd.f32 %v692_v41, %v691_v37  ;;  %v512_v53 = vadd.f32 %v1075_v40, %v1432_v30  ;;  %v651_v59 = vmul.f32 %v509_v42, %v509_v42 }
 0x113   : > { %v595_v48 = vsel %vm563_vm3, %v501_v38, 0.0  ;;  %v649_v49 = vmul.f32 %v501_v38, %v501_v38  ;;  %v504_v50 = vadd.f32 %v503_v45, %v1432_v30  ;;  %v599_v62 = vsel %vm563_vm3, %v509_v42, 0.0 }
 0x114   : > { %v596_v52 = vadd.f32 %v595_v48, %v594_v44  ;;  %v695_v54 = vadd.f32 %v694_v51, %v693_v47  ;;  %v652_v2 = vmul.f32 %v512_v53, %v512_v53  ;;  %v601_v8 = vsel %vm563_vm3, %v512_v53, 0.0 }
 0x115   : > { %v696_v55 = vsel %vm563_vm3, %v649_v49, 0.0  ;;  %v597_v56 = vsel %vm563_vm3, %v504_v50, 0.0  ;;  %v650_v58 = vmul.f32 %v504_v50, %v504_v50  ;;  %v700_v12 = vsel %vm563_vm3, %v651_v59, 0.0 }
 0x116   : > { %v598_v60 = vadd.f32 %v597_v56, %v596_v52  ;;  %v697_v61 = vadd.f32 %v696_v55, %v695_v54  ;;  %v702_v19 = vsel %vm563_vm3, %v652_v2, 0.0  ;;  %v605_v27 = vsel %vm563_vm3, %v520_v6, 0.0 }
 0x117   : > { %v698_v0 = vsel %vm563_vm3, %v650_v58, 0.0  ;;  %v655_v29 = vmul.f32 %v525_v13, %v525_v13  ;;  %v607_v57 = vsel %vm563_vm3, %v525_v13, 0.0  ;;  %v656_v33 = vmul.f32 %v528_v18, %v528_v18 }
 0x118   : > { %v600_v4 = vadd.f32 %v599_v62, %v598_v60  ;;  %v699_v9 = vadd.f32 %v698_v0, %v697_v61  ;;  %v706_v36 = vsel %vm563_vm3, %v654_v22, 0.0  ;;  %v657_v3 = vmul.f32 %v533_v23, %v533_v23 }
 0x119   : > { %v536_v37 = vadd.f32 %v1477_v43, %v1432_v30  ;;  %v609_v38 = vsel %vm563_vm3, %v528_v18, 0.0  ;;  %v611_v34 = vsel %vm563_vm3, %v533_v23, 0.0  ;;  %v708_v41 = vsel %vm563_vm3, %v655_v29, 0.0 }
 0x11a   : > { %v602_v14 = vadd.f32 %v601_v8, %v600_v4  ;;  %v701_v16 = vadd.f32 %v700_v12, %v699_v9  ;;  %v541_v42 = vadd.f32 %v1465_v28, %v1432_v30  ;;  %v710_v45 = vsel %vm563_vm3, %v656_v33, 0.0 }
 0x11b   : > { %v544_v47 = vadd.f32 %v1473_v39, %v1432_v30  ;;  %v712_v43 = vsel %vm563_vm3, %v657_v3, 0.0  ;;  %v658_v49 = vmul.f32 %v536_v37, %v536_v37  ;;  %v549_v50 = vadd.f32 %v1489_v5, %v1432_v30 }
 0x11c   : > { %v604_v7 = vadd.f32 %v603_v10, %v602_v14  ;;  %v703_v26 = vadd.f32 %v702_v19, %v701_v16  ;;  %v613_v52 = vsel %vm563_vm3, %v536_v37, 0.0  ;;  %v659_v53 = vmul.f32 %v541_v42, %v541_v42 }
 0x11d   : > { %v615_v28 = vsel %vm563_vm3, %v541_v42, 0.0  ;;  %v660_v56 = vmul.f32 %v544_v47, %v544_v47  ;;  %v714_v59 = vsel %vm563_vm3, %v658_v49, 0.0  ;;  %v661_v39 = vmul.f32 %v549_v50, %v549_v50 }
 0x11e   : > { %v606_v31 = vadd.f32 %v605_v27, %v604_v7  ;;  %v705_v32 = vadd.f32 %v704_v17, %v703_v26  ;;  %v552_v60 = vadd.f32 %v1497_v15, %v1432_v30  ;;  %v617_v62 = vsel %vm563_vm3, %v544_v47, 0.0 }
 0x11f   : > { %v619_v5 = vsel %vm563_vm3, %v549_v50, 0.0  ;;  %v716_v0 = vsel %vm563_vm3, %v659_v53, 0.0  ;;  %v557_v1 = vadd.f32 %v1485_v63, %v1432_v30  ;;  %v718_v4 = vsel %vm563_vm3, %v660_v56, 0.0 }
 0x120   : > { %v608_v35 = vadd.f32 %v607_v57, %v606_v31  ;;  %v707_v40 = vadd.f32 %v706_v36, %v705_v32  ;;  %v720_v9 = vsel %vm563_vm3, %v661_v39, 0.0  ;;  %v560_v15 = vadd.f32 %v1493_v11, %v1432_v30 }
 0x121   : > { %v662_v10 = vmul.f32 %v552_v60, %v552_v60  ;;  %v621_v13 = vsel %vm563_vm3, %v552_v60, 0.0  ;;  %v663_v14 = vmul.f32 %v557_v1, %v557_v1  ;;  %v623_v17 = vsel %vm563_vm3, %v557_v1, 0.0 }
 0x122   : > { %v610_v44 = vadd.f32 %v609_v38, %v608_v35  ;;  %v709_v46 = vadd.f32 %v708_v41, %v707_v40  ;;  %v664_v63 = vmul.f32 %v560_v15, %v560_v15  ;;  %v625_v22 = vsel %vm563_vm3, %v560_v15, 0.0 }
 0x123   : > { %v722_v7 = vsel %vm563_vm3, %v662_v10, 0.0  ;;  %v724_v26 = vsel %vm563_vm3, %v663_v14, 0.0 }
 0x124   : > { %v612_v48 = vadd.f32 %v611_v34, %v610_v44  ;;  %v711_v51 = vadd.f32 %v710_v45, %v709_v46  ;;  %v726_v11 = vsel %vm563_vm3, %v664_v63, 0.0  ;;  %v884_v46 = vld [vmem:[%s213_s6] sm:$0x3] }
 0x126   : > { %v614_v54 = vadd.f32 %v613_v52, %v612_v48  ;;  %v713_v55 = vadd.f32 %v712_v43, %v711_v51 }
 0x128   : > { %v616_v58 = vadd.f32 %v615_v28, %v614_v54  ;;  %v715_v61 = vadd.f32 %v714_v59, %v713_v55 }
 0x12a   : > { %v618_v2 = vadd.f32 %v617_v62, %v616_v58  ;;  %v717_v6 = vadd.f32 %v716_v0, %v715_v61 }
 0x12c   : > { %v620_v8 = vadd.f32 %v619_v5, %v618_v2  ;;  %v719_v12 = vadd.f32 %v718_v4, %v717_v6 }
 0x12e   : > { %v622_v16 = vadd.f32 %v621_v13, %v620_v8  ;;  %v721_v18 = vadd.f32 %v720_v9, %v719_v12 }
 0x130   : > { %v624_v19 = vadd.f32 %v623_v17, %v622_v16  ;;  %v723_v23 = vadd.f32 %v722_v7, %v721_v18 }
 0x132   : > { %v626_v27 = vadd.f32 %v625_v22, %v624_v19  ;;  %v725_v30 = vadd.f32 %v724_v26, %v723_v23 }
 0x134   : > { %v627_v29 = vrot.slane %v626_v27, 4  ;;  %v727_v31 = vadd.f32 %v726_v11, %v725_v30 }
 0x136   : > { %v628_v57 = vadd.f32 %v627_v29, %v626_v27  ;;  %v728_v32 = vrot.slane %v727_v31, 4 }
 0x138   : > { %v629_v33 = vrot.slane %v628_v57, 2  ;;  %v729_v35 = vadd.f32 %v728_v32, %v727_v31 }
 0x13a   : > { %v630_v36 = vadd.f32 %v629_v33, %v628_v57  ;;  %v730_v3 = vrot.slane %v729_v35, 2 }
 0x13c   : > { %v631_v37 = vrot.slane %v630_v36, 1  ;;  %v731_v40 = vadd.f32 %v730_v3, %v729_v35 }
 0x13e   : > { %v632_v38 = vadd.f32 %v631_v37, %v630_v36  ;;  %v732_v34 = vrot.slane %v731_v40, 1 }
 0x140   : > { %1097 = vmatmul.mubr.msk.f32.vlgmr.msra.gmra.mrb[12].mxu1 %vm563_vm3, %v632_v38  ;;  %v733_v41 = vadd.f32 %v732_v34, %v731_v40 }
 0x141   : > { %1118 = vmatpush3.bf16.msra.mxu1 %v1412_v20  ;;  %1107 = vmatprep.mubr.msk.f32.mxu1 %vm1281_vm2, %v1282_v25 }
 0x142   : > { %1119 = vmatprep.subr.bf16.mxu1 %v1280_v21 }
 0x145   : > { %1121 = vmatpush3.bf16.msra.mxu1 %v1423_v24 }
 0x148   : > { %1108 = vmatmul.mubr.msk.f32.vlgmr.msra.gmra.mrb[14].mxu1 %vm563_vm3, %v733_v41 }
 0x213   : > { %v807_v20 = vpop.f32.mrb[12].mxu1 }
 0x214   : > { %v1098_v42 = vpop.f32.mrb[13].mxu1 }
 0x21b   : > { %v880_v44 = vpop.f32.mrb[14].mxu1 }
 0x21c   : > { %v886_v21 = vrot.slane %v880_v44, 7  ;;  %v1109_v45 = vpop.f32.mrb[15].mxu1 }
 0x21e   : > { %v889_v24 = vsel %vm888_vm5, %v807_v20, %v886_v21 }
 0x21f   : > { %v890_v47 = vadd.f32 %v889_v24, %v884_v46 }
 0x221   : > { %892 = vst.msk [vmem:[%s213_s6] sm:$0x3] %vm229_vm4, %v890_v47 }
 0x222   : > { %1213 = shalt.err (!%p1210_p5)
}
 0x223   : > { %s1214_s22 = scalar_lea.hbm %s1580_s11, 32  ;;  %s1218_s29 = scalar_lea.hbm %s1632_s4, 64 }
 0x224   : > { %p1215_p6 = scmp.ne.s32.totalorder %s1580_s11, %s1214_s22  ;;  %p1219_p10 = scmp.lt.u32.totalorder %s1580_s11, %s1632_s4 }
 0x225   : > { %p1220_p11 = scmp.lt.u32.totalorder %s1218_s29, %s1214_s22  ;;  %p1222_p13 = scmp.lt.u32.totalorder %s1214_s22, %s1580_s11 }
 0x226   : > { %p1216_p7 = pnand %p1215_p6, %p1349_p4 }
 0x227   : > { %p1221_p12 = por %p1220_p11, %p1219_p10 }
 0x228   : > { %p1217_p9 = pneg %p1216_p7 }
 0x229   : > { %p1223_p0 = por %p1222_p13, %p1221_p12 }
 0x22b   : > { %p1224_p1 = pnand %p1223_p0, %p1217_p9 }
 0x22d   : > { %1227 = shalt.err (!%p1224_p1)
}
 0x22e   : > { %1126 = dma.vmem_to_hbm [thread:$0]  (%p1349_p4), %s1582_s8, 32, %s1580_s11, %s894_s12  }
 0x22f PF: > { %p1132_p2 = scmp.ge.s32.totalorder %s1278_s20, 2  ;;  %s919_s6 = sand.u32 1, %s1258_s15  }
 0x230   : > { %s920_s7 = scalar_lea.sflag [#allocation3], %s919_s6 }
 0x231   : > { %p1129_p3 = pnand %p1132_p2, %p1356_p8 }
 0x233   : > { %1253 = dma.done.wait (!%p1129_p3), %s920_s7, 32  }
 0x234   : > { %1255 = vsyncadd (!%p1129_p3), %s920_s7, 4294967264  ;;  %s17_s20 = sadd.s32 1, %s1278_s20   ;;  %s1635_s15 = smov %s1262_s16 }
 0x235   : > { %p14_p5 = scmp.ge.s32.totalorder %s17_s20, 4   ;;  %s1636_s16 = smov %s1266_s17 }
 0x236   : > { %s1637_s17 = smov %s1362_s28  ;;  %s1638_s18 = smov %s1274_s19 }
 0x237   : > { %s1639_s19 = smov %s1641_s23  ;;  %16 = sbr.rel (!%p14_p5) target bundleno = 4 (0x4), region = 75 }
 0x23e   :  { %925 = vsyncpa [#allocation3], 1 }
 0x23f   :  { %927 = vsyncpa [#allocation3 + $0x1], 1 }

</bundles_post_ra>
